<compile_context>
chip_gen: v5e
topology: v5e:2x2
jax: 0.10.0
libtpu: 0.0.40
codegen_flags: <defaults>
</compile_context>

<pallas_src>
import jax
import jax.numpy as jnp
from jax import lax
from jax.experimental import pallas as pl
from jax.experimental.pallas import tpu as pltpu

_TARGET_BLOCK_BYTES = 1 << 20  # ~1 MiB per input block; <= ~6 MiB double-buffered


def _round_up(a: int, m: int) -> int:
    return ((a + m - 1) // m) * m


def _cdiv(a: int, b: int) -> int:
    return -(-a // b)


def _make_iou_kernel(n_valid: int, block_planes: int, blocks_per_core: int,
                     weight_mode: str, needs_plane_mask: bool):
    """Grid: (core, plane_block, hw_block); hw_block is the reduction axis."""

    def kernel(*refs):
        if weight_mode == "none":
            x_ref, y_ref, out_ref, iand_acc, sxy_acc, iou_acc = refs
            w_ref = None
        else:
            x_ref, y_ref, w_ref, out_ref, iand_acc, sxy_acc, iou_acc = refs

        c = pl.program_id(0)
        i = pl.program_id(1)
        j = pl.program_id(2)
        ni = pl.num_programs(1)
        nj = pl.num_programs(2)

        # Start of this core's chunk: reset the per-core IoU accumulator.
        @pl.when(jnp.logical_and(i == 0, j == 0))
        def _():
            iou_acc[...] = jnp.zeros_like(iou_acc)

        # Start of a plane block: reset the per-plane partial sums.
        @pl.when(j == 0)
        def _():
            iand_acc[...] = jnp.zeros_like(iand_acc)
            sxy_acc[...] = jnp.zeros_like(sxy_acc)

        x = x_ref[...].astype(jnp.float32)
        y = y_ref[...].astype(jnp.float32)
        if weight_mode == "full":
            w = w_ref[...].astype(jnp.float32)
            x = x * w
            y = y * w

        # Per-plane partial reductions over the lane-dense spatial axis.
        iand_acc[...] += jnp.sum(x * y, axis=-1, keepdims=True)
        sxy_acc[...] += (jnp.sum(x, axis=-1, keepdims=True) +
                         jnp.sum(y, axis=-1, keepdims=True))

        # Plane finished (last spatial tile): fold this block into sum(IoU).
        @pl.when(j == nj - 1)
        def _():
            iand = iand_acc[...]
            s = sxy_acc[...]
            if weight_mode == "plane":
                wp = w_ref[...].astype(jnp.float32)   # (TN, 1) per-plane weight
                iand = iand * wp * wp                 # sum(wx * wy) = w^2 sum(xy)
                s = s * wp                            # sum(wx) + sum(wy) = w * S
            ior = s - iand
            if needs_plane_mask:
                row = lax.broadcasted_iota(jnp.int32, iand.shape, 0)
                plane = (c * blocks_per_core + i) * block_planes + row
                valid = plane < n_valid
                # Padded planes contribute exactly 0 (guard their 0/0); real
                # planes keep the reference semantics (Ior == 0 -> NaN/Inf).
                safe_ior = jnp.where(valid, ior, jnp.float32(1.0))
                iou = jnp.where(valid, iand / safe_ior, jnp.float32(0.0))
            else:
                iou = iand / ior
            iou_acc[...] += jnp.sum(iou)

        # Last plane block of this core: emit the per-core partial sum(IoU).
        @pl.when(jnp.logical_and(i == ni - 1, j == nj - 1))
        def _():
            out_ref[...] = iou_acc[...].reshape(1, 1, 1)

    return kernel


def iou_loss(x, y, weight=None, *, block_planes=None, block_hw=None):
    """Pallas implementation of IOU_Loss.forward.  x, y: (B, C, H, W)."""
    B, C, H, W = x.shape
    n = B * C
    hw = H * W
    itemsize = jnp.dtype(x.dtype).itemsize

    # ---- classify the weight ------------------------------------------------
    weight_mode = "none"
    w_plane = None
    w_full = None
    if weight is not None:
        w = jnp.asarray(weight)
        w4 = w.reshape((1,) * (4 - w.ndim) + tuple(w.shape))
        if w4.shape[-1] == 1 and w4.shape[-2] == 1:
            # Scalar / per-batch / per-channel: fold in analytically, do NOT
            # stream a broadcast (B, C, H, W) copy from HBM.
            weight_mode = "plane"
            w_plane = jnp.broadcast_to(w4[..., 0, 0], (B, C))
            w_plane = w_plane.reshape(n, 1).astype(jnp.float32)
        else:
            weight_mode = "full"
            w_full = jnp.broadcast_to(w4, x.shape).astype(x.dtype)

    # ---- choose tile sizes ----------------------------------------------------
    if block_hw is None:
        max_thw = max(128, (_TARGET_BLOCK_BYTES // (8 * itemsize)) // 128 * 128)
        thw = hw if hw <= max_thw else max_thw
    else:
        thw = min(_round_up(block_hw, 128), _round_up(hw, 128))
        if thw >= hw:
            thw = hw
    hw_pad = _round_up(hw, thw)
    hw_blocks = hw_pad // thw

    if block_planes is None:
        tn = (_TARGET_BLOCK_BYTES // (thw * itemsize)) // 8 * 8
        tn = max(8, min(tn, _round_up(n, 8)))
    else:
        tn = min(_round_up(block_planes, 8), _round_up(n, 8))

    total_blocks = _cdiv(n, tn)
    num_cores = 2 if total_blocks >= 2 else 1     # v7x: 2 TCs; no-op on v5e/v6e
    bpc = _cdiv(total_blocks, num_cores)
    n_pad = num_cores * bpc * tn
    needs_plane_mask = n_pad != n

    # ---- flatten + pad to (n_pad, hw_pad), lane-dense spatial axis last ------
    def prep(a):
        a = a.reshape(n, hw)
        if n_pad != n or hw_pad != hw:
            a = jnp.pad(a, ((0, n_pad - n), (0, hw_pad - hw)))
        return a

    xf = prep(x)
    yf = prep(y)

    plane_spec = pl.BlockSpec((tn, thw), lambda c, i, j: (c * bpc + i, j))

    operands = [xf, yf]
    in_specs = [plane_spec, plane_spec]
    if weight_mode == "full":
        operands.append(prep(w_full))
        in_specs.append(plane_spec)
    elif weight_mode == "plane":
        wp = w_plane
        if n_pad != n:
            wp = jnp.pad(wp, ((0, n_pad - n), (0, 0)), constant_values=1.0)
        operands.append(wp)
        in_specs.append(pl.BlockSpec((tn, 1), lambda c, i, j: (c * bpc + i, 0)))

    kernel = _make_iou_kernel(n, tn, bpc, weight_mode, needs_plane_mask)

    partial = pl.pallas_call(
        kernel,
        out_shape=jax.ShapeDtypeStruct((num_cores, 1, 1), jnp.float32),
        grid_spec=pltpu.PrefetchScalarGridSpec(
            num_scalar_prefetch=0,
            grid=(num_cores, bpc, hw_blocks),
            in_specs=in_specs,
            out_specs=pl.BlockSpec((1, 1, 1), lambda c, i, j: (c, 0, 0)),
            scratch_shapes=[
                pltpu.VMEM((tn, 1), jnp.float32),  # per-plane Iand partial
                pltpu.VMEM((tn, 1), jnp.float32),  # per-plane sum(x)+sum(y) partial
                pltpu.VMEM((1, 1), jnp.float32),   # per-core sum(IoU)
            ],
        ),
        compiler_params=pltpu.CompilerParams(
            dimension_semantics=("parallel", "arbitrary", "arbitrary"),
        ),
    )(*operands)

    # Tiny finalization in plain JAX: 1 - mean(IoU).
    return 1.0 - jnp.sum(partial) / jnp.float32(n)


def iou_loss_ref(x, y, weight=None):
    """Pure-JAX reference (mirrors the PyTorch forward)."""
    if weight is not None:
        x = x * weight
        y = y * weight
    iand = jnp.sum(x * y, axis=(2, 3))
    ior = jnp.sum(x + y, axis=(2, 3)) - iand
    return 1.0 - jnp.mean(iand / ior)


if __name__ == "__main__":
    key = jax.random.PRNGKey(0)
    kx, ky, kw = jax.random.split(key, 3)
    B, C, H, W = 2, 4, 16, 16
    # Positive inputs (like sigmoid probabilities / masks) so Ior > 0.
    x = jax.random.uniform(kx, (B, C, H, W), dtype=jnp.float32)
    y = jax.random.uniform(ky, (B, C, H, W), dtype=jnp.float32)
    w_full = jax.random.uniform(kw, (B, C, H, W), dtype=jnp.float32) + 0.5
    w_chan = jax.random.uniform(kw, (1, C, 1, 1), dtype=jnp.float32) + 0.5

    def check(out, ref, name):
        assert jnp.allclose(out, ref, atol=1e-5, rtol=1e-5), (name, out, ref)

    # Default config: lane-dense full-plane blocks.
    check(jax.block_until_ready(iou_loss(x, y)), iou_loss_ref(x, y), "plain")
    # Full-spatial weight: streamed as a third operand.
    check(jax.block_until_ready(iou_loss(x, y, w_full)),
          iou_loss_ref(x, y, w_full), "w_full")
    # Per-channel weight: folded analytically, no (B,C,H,W) broadcast streamed.
    check(jax.block_until_ready(iou_loss(x, y, w_chan)),
          iou_loss_ref(x, y, w_chan), "w_chan")

    # Larger plane count: exercises multi-plane blocks, the 2-way core split
    # ("parallel" leading axis) and within-plane spatial tiling.
    B2, C2 = 4, 8
    x2 = jax.random.uniform(kx, (B2, C2, H, W), dtype=jnp.float32)
    y2 = jax.random.uniform(ky, (B2, C2, H, W), dtype=jnp.float32)
    w2_chan = jax.random.uniform(kw, (1, C2, 1, 1), dtype=jnp.float32) + 0.5
    check(jax.block_until_ready(iou_loss(x2, y2, block_planes=8, block_hw=128)),
          iou_loss_ref(x2, y2), "tiled")
    check(jax.block_until_ready(
              iou_loss(x2, y2, w2_chan, block_planes=8, block_hw=128)),
          iou_loss_ref(x2, y2, w2_chan), "tiled_w_chan")

    print("KERNEL_OK")
</pallas_src>

<mosaic_0001>
module attributes {stable_mosaic.version = 11 : i64} {
  func.func @kernel(%arg0: i32, %arg1: i32, %arg2: i32, %arg3: memref<8x256xf32, #tpu.memory_space<vmem>>, %arg4: memref<8x256xf32, #tpu.memory_space<vmem>>, %arg5: memref<1x1x1xf32, #tpu.memory_space<vmem>>, %arg6: memref<8x1xf32, #tpu.memory_space<vmem>>, %arg7: memref<8x1xf32, #tpu.memory_space<vmem>>, %arg8: memref<1x1xf32, #tpu.memory_space<vmem>>) attributes {dimension_semantics = [#tpu.dimension_semantics<parallel>, #tpu.dimension_semantics<arbitrary>, #tpu.dimension_semantics<arbitrary>], iteration_bounds = array<i64: 1, 1, 1>, scalar_prefetch = 0 : i64, scratch_operands = 3 : i64, tpu.core_type = #tpu.core_type<tc>, window_params = [{transform_indices = @transform_0, window_bounds = array<i64: 8, 256>}, {transform_indices = @transform_1, window_bounds = array<i64: 8, 256>}, {transform_indices = @transform_2, window_bounds = array<i64: 1, 1, 1>}]} {
    %c0_i32 = arith.constant 0 : i32
    %0 = arith.cmpi eq, %arg1, %c0_i32 : i32
    %c0_i32_0 = arith.constant 0 : i32
    %1 = arith.cmpi eq, %arg2, %c0_i32_0 : i32
    %2 = arith.andi %0, %1 : i1
    %3 = arith.extui %2 : i1 to i32
    %c0_i32_1 = arith.constant 0 : i32
    %4 = arith.cmpi ne, %3, %c0_i32_1 : i32
    scf.if %4 {
      %cst_22 = arith.constant 0.000000e+00 : f32
      %32 = vector.broadcast %cst_22 : f32 to vector<1x1xf32>
      %c0_23 = arith.constant 0 : index
      %c0_24 = arith.constant 0 : index
      %33 = vector.load %arg8[%c0_23, %c0_24] : memref<1x1xf32, #tpu.memory_space<vmem>>, vector<1x1xf32>
      tpu.vector_store %arg8[%c0_23, %c0_24], %32 {strides = array<i32>} : memref<1x1xf32, #tpu.memory_space<vmem>>, vector<1x1xf32>,
    } else {
    }
    %c0_i32_2 = arith.constant 0 : i32
    %5 = arith.cmpi eq, %arg2, %c0_i32_2 : i32
    %6 = arith.extui %5 : i1 to i32
    %c0_i32_3 = arith.constant 0 : i32
    %7 = arith.cmpi ne, %6, %c0_i32_3 : i32
    scf.if %7 {
      %cst_22 = arith.constant 0.000000e+00 : f32
      %32 = vector.broadcast %cst_22 : f32 to vector<8x1xf32>
      %c0_23 = arith.constant 0 : index
      %c0_24 = arith.constant 0 : index
      %33 = vector.load %arg6[%c0_23, %c0_24] : memref<8x1xf32, #tpu.memory_space<vmem>>, vector<8x1xf32>
      tpu.vector_store %arg6[%c0_23, %c0_24], %32 {strides = array<i32>} : memref<8x1xf32, #tpu.memory_space<vmem>>, vector<8x1xf32>,
      %cst_25 = arith.constant 0.000000e+00 : f32
      %34 = vector.broadcast %cst_25 : f32 to vector<8x1xf32>
      %c0_26 = arith.constant 0 : index
      %c0_27 = arith.constant 0 : index
      %35 = vector.load %arg7[%c0_26, %c0_27] : memref<8x1xf32, #tpu.memory_space<vmem>>, vector<8x1xf32>
      tpu.vector_store %arg7[%c0_26, %c0_27], %34 {strides = array<i32>} : memref<8x1xf32, #tpu.memory_space<vmem>>, vector<8x1xf32>,
    } else {
    }
    %c0 = arith.constant 0 : index
    %c0_4 = arith.constant 0 : index
    %8 = vector.load %arg3[%c0, %c0_4] : memref<8x256xf32, #tpu.memory_space<vmem>>, vector<8x256xf32>
    %c0_5 = arith.constant 0 : index
    %c0_6 = arith.constant 0 : index
    %9 = vector.load %arg4[%c0_5, %c0_6] : memref<8x256xf32, #tpu.memory_space<vmem>>, vector<8x256xf32>
    %c0_7 = arith.constant 0 : index
    %c0_8 = arith.constant 0 : index
    %10 = vector.load %arg6[%c0_7, %c0_8] : memref<8x1xf32, #tpu.memory_space<vmem>>, vector<8x1xf32>
    %11 = arith.mulf %8, %9 : vector<8x256xf32>
    %cst = arith.constant dense<0.000000e+00> : vector<8xf32>
    %12 = vector.multi_reduction <add>, %11, %cst [1] : vector<8x256xf32> to vector<8xf32>
    %13 = vector.shape_cast %12 : vector<8xf32> to vector<8x1xf32>
    %14 = arith.addf %10, %13 : vector<8x1xf32>
    %c0_9 = arith.constant 0 : index
    %c0_10 = arith.constant 0 : index
    %15 = vector.load %arg6[%c0_9, %c0_10] : memref<8x1xf32, #tpu.memory_space<vmem>>, vector<8x1xf32>
    tpu.vector_store %arg6[%c0_9, %c0_10], %14 {strides = array<i32>} : memref<8x1xf32, #tpu.memory_space<vmem>>, vector<8x1xf32>,
    %c0_11 = arith.constant 0 : index
    %c0_12 = arith.constant 0 : index
    %16 = vector.load %arg7[%c0_11, %c0_12] : memref<8x1xf32, #tpu.memory_space<vmem>>, vector<8x1xf32>
    %cst_13 = arith.constant dense<0.000000e+00> : vector<8xf32>
    %17 = vector.multi_reduction <add>, %8, %cst_13 [1] : vector<8x256xf32> to vector<8xf32>
    %18 = vector.shape_cast %17 : vector<8xf32> to vector<8x1xf32>
    %cst_14 = arith.constant dense<0.000000e+00> : vector<8xf32>
    %19 = vector.multi_reduction <add>, %9, %cst_14 [1] : vector<8x256xf32> to vector<8xf32>
    %20 = vector.shape_cast %19 : vector<8xf32> to vector<8x1xf32>
    %21 = arith.addf %18, %20 : vector<8x1xf32>
    %22 = arith.addf %16, %21 : vector<8x1xf32>
    %c0_15 = arith.constant 0 : index
    %c0_16 = arith.constant 0 : index
    %23 = vector.load %arg7[%c0_15, %c0_16] : memref<8x1xf32, #tpu.memory_space<vmem>>, vector<8x1xf32>
    tpu.vector_store %arg7[%c0_15, %c0_16], %22 {strides = array<i32>} : memref<8x1xf32, #tpu.memory_space<vmem>>, vector<8x1xf32>,
    %c0_i32_17 = arith.constant 0 : i32
    %24 = arith.cmpi eq, %arg2, %c0_i32_17 : i32
    %25 = arith.extui %24 : i1 to i32
    %c0_i32_18 = arith.constant 0 : i32
    %26 = arith.cmpi ne, %25, %c0_i32_18 : i32
    scf.if %26 {
      %c0_22 = arith.constant 0 : index
      %c0_23 = arith.constant 0 : index
      %32 = vector.load %arg6[%c0_22, %c0_23] : memref<8x1xf32, #tpu.memory_space<vmem>>, vector<8x1xf32>
      %c0_24 = arith.constant 0 : index
      %c0_25 = arith.constant 0 : index
      %33 = vector.load %arg7[%c0_24, %c0_25] : memref<8x1xf32, #tpu.memory_space<vmem>>, vector<8x1xf32>
      %34 = arith.subf %33, %32 : vector<8x1xf32>
      %35 = arith.divf %32, %34 : vector<8x1xf32>
      %c0_26 = arith.constant 0 : index
      %c0_27 = arith.constant 0 : index
      %36 = vector.load %arg8[%c0_26, %c0_27] : memref<1x1xf32, #tpu.memory_space<vmem>>, vector<1x1xf32>
      %37 = vector.shape_cast %35 : vector<8x1xf32> to vector<1x8x1xf32>
      %cst_28 = arith.constant dense<0.000000e+00> : vector<1xf32>
      %38 = vector.multi_reduction <add>, %37, %cst_28 [1, 2] : vector<1x8x1xf32> to vector<1xf32>
      %39 = vector.shape_cast %38 : vector<1xf32> to vector<1x1x1xf32>
      %40 = vector.extract %39[0, 0, 0] : f32 from vector<1x1x1xf32>
      %41 = vector.broadcast %40 : f32 to vector<1x1xf32>
      %42 = arith.addf %36, %41 : vector<1x1xf32>
      %c0_29 = arith.constant 0 : index
      %c0_30 = arith.constant 0 : index
      %43 = vector.load %arg8[%c0_29, %c0_30] : memref<1x1xf32, #tpu.memory_space<vmem>>, vector<1x1xf32>
      tpu.vector_store %arg8[%c0_29, %c0_30], %42 {strides = array<i32>} : memref<1x1xf32, #tpu.memory_space<vmem>>, vector<1x1xf32>,
    } else {
    }
    %c0_i32_19 = arith.constant 0 : i32
    %27 = arith.cmpi eq, %arg1, %c0_i32_19 : i32
    %c0_i32_20 = arith.constant 0 : i32
    %28 = arith.cmpi eq, %arg2, %c0_i32_20 : i32
    %29 = arith.andi %27, %28 : i1
    %30 = arith.extui %29 : i1 to i32
    %c0_i32_21 = arith.constant 0 : i32
    %31 = arith.cmpi ne, %30, %c0_i32_21 : i32
    scf.if %31 {
      %c0_22 = arith.constant 0 : index
      %c0_23 = arith.constant 0 : index
      %32 = vector.load %arg8[%c0_22, %c0_23] : memref<1x1xf32, #tpu.memory_space<vmem>>, vector<1x1xf32>
      %33 = vector.shape_cast %32 : vector<1x1xf32> to vector<1x1x1xf32>
      %c0_24 = arith.constant 0 : index
      %c0_25 = arith.constant 0 : index
      %c0_26 = arith.constant 0 : index
      %34 = vector.load %arg5[%c0_24, %c0_25, %c0_26] : memref<1x1x1xf32, #tpu.memory_space<vmem>>, vector<1x1x1xf32>
      tpu.vector_store %arg5[%c0_24, %c0_25, %c0_26], %33 {strides = array<i32>} : memref<1x1x1xf32, #tpu.memory_space<vmem>>, vector<1x1x1xf32>,
    } else {
    }
    return
  }
  func.func @transform_0(%arg0: i32, %arg1: i32, %arg2: i32) -> (i32, i32) {
    %c1_i32 = arith.constant 1 : i32
    %0 = arith.muli %arg0, %c1_i32 : i32
    %1 = arith.addi %0, %arg1 : i32
    %c0_i32 = arith.constant 0 : i32
    return %1, %arg2 : i32, i32
  }
  func.func @transform_1(%arg0: i32, %arg1: i32, %arg2: i32) -> (i32, i32) {
    %c1_i32 = arith.constant 1 : i32
    %0 = arith.muli %arg0, %c1_i32 : i32
    %1 = arith.addi %0, %arg1 : i32
    %c0_i32 = arith.constant 0 : i32
    return %1, %arg2 : i32, i32
  }
  func.func @transform_2(%arg0: i32, %arg1: i32, %arg2: i32) -> (i32, i32, i32) {
    %c0_i32 = arith.constant 0 : i32
    %c0_i32_0 = arith.constant 0 : i32
    %c0_i32_1 = arith.constant 0 : i32
    return %arg0, %c0_i32, %c0_i32_0 : i32, i32, i32
  }
}

</mosaic_0001>

<bundles_post_ra>
// kernel: tpu_custom_call.1
= control target key start
LH: loop header
LB: loop body
LE: loop exit
PB: predicated region body
PF: predicated region fallthrough
CT: control target
= control target key end

     0   :  { %7 = vsyncpa [#allocation6], 0  ;;  %s268_s0 = inlined_call_operand.hbm [shape: f32[8,256], index: 0, kind: input, shape index: {}]   ;;  %s269_s1 = inlined_call_operand.hbm [shape: f32[8,256], index: 1, kind: input, shape index: {}]   ;;  %s270_s2 = inlined_call_operand.hbm [shape: f32[1,1,1], index: 2, kind: output, shape index: {}]  }
   0x1   :  { %8 = vsyncpa [#allocation9], 0 }
   0x2   :  { %9 = vsyncpa [#allocation7], 0  ;;  %s19_s11 = sshll.u32 %s268_s0, 4  ;;  %s232_s12 = smov [#allocation5]   ;;  %s20_s11 = int_to_ptr.hbm [resolvable:$true] %s19_s11 }
   0x3   :  { %s21_s13 = sshll.u32 %s232_s12, 4  ;;  %s34_s16 = sshll.u32 %s269_s1, 4  ;;  %s22_s13 = int_to_ptr.vmem [resolvable:$true] %s21_s13  ;;  %s35_s16 = int_to_ptr.hbm [resolvable:$true] %s34_s16 }
   0x4   :  { %24 = dma.hbm_to_vmem [thread:$0]  %s20_s11, 256, %s22_s13, [#allocation6]  }
   0x5   :  { %s233_s17 = smov [#allocation8]  }
   0x6   :  { %s36_s18 = sshll.u32 %s233_s17, 4  ;;  %s37_s18 = int_to_ptr.vmem [resolvable:$true] %s36_s18 }
   0x7   :  { %39 = dma.hbm_to_vmem [thread:$0]  %s35_s16, 256, %s37_s18, [#allocation9]  }
   0x8   :  { %226 = dma.done.wait [#allocation6], 256  }
   0x9   :  { %227 = vsyncadd [#allocation6], 4294967040 }
   0xa   :  { %228 = dma.done.wait [#allocation9], 256  }
   0xb   :  { %229 = vsyncadd [#allocation9], 4294967040  ;;  %v64_v0 = vld [vmem:[#allocation5] sm:$0xff]  ;;  %v65_v1 = vld [vmem:[#allocation5 + $0x8] sm:$0xff]  ;;  %vm61_vm0 = vcmask 7168   ;;  %v234_v9 = vmov 0.0  }
   0xc   :  { %v66_v2 = vld [vmem:[#allocation8] sm:$0xff]  ;;  %v78_v3 = vadd.f32 %v65_v1, %v64_v0  ;;  %v67_v4 = vld [vmem:[#allocation8 + $0x8] sm:$0xff]  ;;  %63 = vst.msk [vmem:[#allocation3] sm:$0xff] %vm61_vm0, %v234_v9  ;;  %vm56_vm5 = vcmask 0   ;;  %s235_s1 = smov [#allocation10]   ;;  %s135_s22 = sshll.u32 %s270_s2, 4  ;;  %s136_s22 = int_to_ptr.hbm [resolvable:$true] %s135_s22 }
   0xd   :  { %v69_v5 = vmul.f32 %v66_v2, %v64_v0  ;;  %v70_v6 = vmul.f32 %v67_v4, %v65_v1  ;;  %v81_v8 = vadd.f32 %v67_v4, %v66_v2  ;;  %62 = vst.msk [vmem:[#allocation2] sm:$0xff] %vm61_vm0, %v234_v9  ;;  %s133_s19 = sshll.u32 %s235_s1, 4  ;;  %s134_s19 = int_to_ptr.vmem [resolvable:$true] %s133_s19 }
   0xe   :  { %79 = vadd.xlane.f32.xlu0 %v78_v3  ;;  %57 = vst.msk [vmem:[#allocation4] sm:$0x1] %vm56_vm5, %v234_v9 }
   0xf   :  { %v71_v7 = vadd.f32 %v70_v6, %v69_v5 }
  0x11   :  { %72 = vadd.xlane.f32.xlu1 %v71_v7 }
  0x13   :  { %v77_v15 = vld [vmem:[#allocation3] sm:$0xff] }
  0x14   :  { %v68_v11 = vld [vmem:[#allocation2] sm:$0xff] }
  0x15   :  { %v108_v40 = vld [vmem:[#allocation4] sm:$0x1] }
  0x16   :  { %82 = vadd.xlane.f32.xlu0 %v81_v8 }
  0x81   :  { %v80_v10 = vpop.xlane.xlu0 %79 }
  0x84   :  { %v73_v12 = vpop.xlane.xlu1 %72 }
  0x85   :  { %v74_v13 = vadd.f32 %v73_v12, %v68_v11 }
  0x87   :  { %76 = vst.msk [vmem:[#allocation2] sm:$0xff] %vm61_vm0, %v74_v13 }
  0x89   :  { %v83_v14 = vpop.xlane.xlu0 %82 }
  0x8a   :  { %v84_v16 = vadd.f32 %v83_v14, %v80_v10 }
  0x8c   :  { %v85_v17 = vadd.f32 %v84_v16, %v77_v15 }
  0x8e   :  { %86 = vst.msk [vmem:[#allocation3] sm:$0xff] %vm61_vm0, %v85_v17  ;;  %v90_v18 = vld [vmem:[#allocation2] sm:$0xff] }
  0x95   :  { %v91_v19 = vld [vmem:[#allocation3] sm:$0xff] }
  0x96   :  { %v92_v20 = vsub.f32 %v91_v19, %v90_v18 }
  0x98   :  { %152 = vrcp.f32 %v92_v20  ;;  %v104_v24 = vand.u32 2147483648, %v92_v20  ;;  %v102_v26 = vand.u32 2147483647, %v92_v20  ;;  %vm98_vm2 = vweird.f32 %v92_v20 }
  0x9a   :  { %v105_v28 = vor.u32 1.1754944e-38, %v104_v24  ;;  %vm103_vm4 = vcmp.eq.f32.partialorder %v102_v26, 8.507059e+37 }
  0x9e   :  { %v153_v21 = vpop.eup %152 }
  0x9f   :  { %v94_v22 = vmul.f32 %v153_v21, %v92_v20  ;;  %vm99_vm1 = vweird.f32 %v153_v21 }
  0xa0   :  { %vm100_vm3 = vmor %vm98_vm2, %vm99_vm1 }
  0xa1   :  { %v95_v23 = vsub.f32 1.0, %v94_v22 }
  0xa3   :  { %v96_v25 = vmul.f32 %v153_v21, %v95_v23 }
  0xa5   :  { %v97_v27 = vadd.f32 %v153_v21, %v96_v25 }
  0xa7   :  { %v101_v29 = vsel %vm100_vm3, %v153_v21, %v97_v27 }
  0xa8   :  { %v106_v30 = vsel %vm103_vm4, %v105_v28, %v101_v29 }
  0xa9   :  { %v107_v31 = vmul.f32 %v106_v30, %v90_v18 }
  0xab   :  { %v109_v32 = vsel %vm61_vm0, %v107_v31, 0.0 }
  0xac   :  { %110 = vadd.xlane.f32.xlu1 %v109_v32 }
 0x11f   :  { %v111_v33 = vpop.xlane.xlu1 %110 }
 0x120   :  { %v112_v34 = vrot.slane %v111_v33, 4 }
 0x122   :  { %v113_v35 = vadd.f32 %v112_v34, %v111_v33 }
 0x124   :  { %v114_v36 = vrot.slane %v113_v35, 2 }
 0x126   :  { %v115_v37 = vadd.f32 %v114_v36, %v113_v35 }
 0x128   :  { %v116_v38 = vrot.slane %v115_v37, 1 }
 0x12a   :  { %v117_v39 = vadd.f32 %v116_v38, %v115_v37 }
 0x12c   :  { %146 = vpush %v117_v39 }
 0x15d   :  { %s147_s0 = spop %146 }
 0x15e   :  { %v119_v41 = vstv %s147_s0 }
 0x15f   :  { %v120_v42 = vadd.f32 %v119_v41, %v108_v40 }
 0x161   :  { %122 = vst.msk [vmem:[#allocation4] sm:$0x1] %vm56_vm5, %v120_v42 }
 0x168   :  { %v125_v43 = vld [vmem:[#allocation4] sm:$0x1] }
 0x169   :  { %127 = vst.msk [vmem:[#allocation10] sm:$0x1] %vm56_vm5, %v125_v43 }
 0x16a   :  { %138 = dma.vmem_to_hbm [thread:$0]  %s134_s19, 16, %s136_s22, [#allocation7]  }
 0x16b   :  { %230 = dma.done.wait [#allocation7], 16  }
 0x16c   :  { %231 = vsyncadd [#allocation7], 4294967280 }
 0x16d   :  { %143 = vsyncpa [#allocation6], 1 }
 0x16e   :  { %144 = vsyncpa [#allocation9], 1 }
 0x16f   :  { %145 = vsyncpa [#allocation7], 1 }

</bundles_post_ra>
